<compile_context>
chip_gen: v7x
topology: tpu7x:2x2x1
jax: 0.10.0
libtpu: 0.0.40
codegen_flags: <defaults>
</compile_context>

<pallas_src>
import jax
import jax.numpy as jnp
from jax import lax
from jax.experimental import pallas as pl
from jax.experimental.pallas import tpu as pltpu

# ---- problem sizes (small, consistent with the module) ----
B = 8              # batch_size
IN = 16            # input_size
H = 32             # hidden_size
FC = [32, 32]      # fc_layers (len > 1 -> skip_projection path is used)
F0, F1 = FC
T_STEPS = 8        # sequence length stepped inside the kernel
LN_EPS = 1e-5

# MXU operand dtype (accumulation is always f32).  Set to jnp.float32 for
# bit-tight parity with the f32 module reference.
MXU_DTYPE = jnp.bfloat16

# ---- packed weight-slab row offsets (lane width 128 = 4H everywhere) ----
R_W0SK = 0                   # rows [0, 4H)        : z -> [layer0(2F0) | skip(2H)]
R_W12 = 4 * H                # rows [4H, 4H+2F0)   : lanes [0,2F1)=W1, [2F1,2F1+2H)=W2
R_WHH = R_W12 + 2 * F0       # rows [.., ..+H)     : LN-folded W_hh^T
R_WIH = R_WHH + H            # rows [.., ..+IN)    : W_ih^T
R_END = R_WIH + IN           # 240

# ---- aux block ([B+8, 128] f32) row offsets ----
#   rows 0:B        initial carried state [hp0 | cp0 | pad]
A_B01 = B                    # lanes [0,2F0)=b0, [2F0,2F0+2F1)=b1
A_B2 = B + 1                 # lanes [0,2H)=b2+b_skip, [2H,3H)=cell LN g, [3H,4H)=cell LN b
A_BL = B + 2                 # lanes [0,4H)=b_ih + b_hh + hidden-LN beta @ W_hh^T
AUX_ROWS = B + 8


# ---------------------------------------------------------------------------
# Pallas kernel: one LatticeRNNCell step per grid iteration, state carried in
# VMEM scratch, weights / biases resident across the whole sequence.
# ---------------------------------------------------------------------------
def lattice_seq_kernel(step_ref, w_ref, aux_ref, out_ref, carry_ref):
    f32 = jnp.float32
    t = pl.program_id(0)

    # Initialize the time-carried state [hp | cp] on the first step only.
    @pl.when(t == 0)
    def _():
        carry_ref[...] = aux_ref[0:B, 0:2 * H]

    # ---- per-step packed input: lanes [h_spatial | c_spatial | x] ----
    step = step_ref[0]                                   # [B, 2H+IN]
    hc_sp = step[:, 0:2 * H]
    x = step[:, 2 * H:2 * H + IN].astype(MXU_DTYPE)

    # ---- bias / LN rows (f32, static slices of the resident aux block) ----
    b0 = aux_ref[A_B01:A_B01 + 1, 0:2 * F0]              # [1, 64]
    b1 = aux_ref[A_B01:A_B01 + 1, 2 * F0:2 * F0 + 2 * F1]
    b2sk = aux_ref[A_B2:A_B2 + 1, 0:2 * H]               # combined b2 + b_skip
    cn_g = aux_ref[A_B2:A_B2 + 1, 2 * H:3 * H]           # cell_norm gamma
    cn_b = aux_ref[A_B2:A_B2 + 1, 3 * H:4 * H]           # cell_norm beta
    blstm = aux_ref[A_BL:A_BL + 1, 0:4 * H]              # folded LSTM bias

    # Z lanes: [h | c | hp | cp]  (carry is already in [hp|cp] order).
    z = jnp.concatenate([hc_sp, carry_ref[...]], axis=1).astype(MXU_DTYPE)   # [8,128]

    # Independent matmuls first: fused (FCNN layer-0 | skip) and x @ W_ih^T.
    a = jnp.dot(z, w_ref[R_W0SK:R_W0SK + 4 * H, :],
                preferred_element_type=f32)              # [8,128] = [y0_pre | skip]
    gx = jnp.dot(x, w_ref[R_WIH:R_WIH + IN, :],
                 preferred_element_type=f32)             # [8,128]

    y0 = jnp.maximum(a[:, 0:2 * F0] + b0, 0.0).astype(MXU_DTYPE)
    skip = a[:, 2 * F0:2 * F0 + 2 * H]

    y1 = jnp.maximum(
        jnp.dot(y0, w_ref[R_W12:R_W12 + 2 * F0, 0:2 * F1],
                preferred_element_type=f32) + b1, 0.0).astype(MXU_DTYPE)
    proc = (jnp.dot(y1, w_ref[R_W12:R_W12 + 2 * F0, 2 * F1:2 * F1 + 2 * H],
                    preferred_element_type=f32) + skip + b2sk)              # [8, 2H]

    # ---- per-path LayerNorm over each 32-lane half ----
    def ln_core(v):
        mu = jnp.mean(v, axis=-1, keepdims=True)
        var = jnp.mean(jnp.square(v - mu), axis=-1, keepdims=True)
        return (v - mu) * lax.rsqrt(var + LN_EPS)

    ph = ln_core(proc[:, 0:H])                      # hidden path: affine folded into W_hh
    pc = ln_core(proc[:, H:2 * H]) * cn_g + cn_b    # cell path keeps its affine

    # ---- LSTMCell gates: ph @ (LN-folded W_hh^T) + x @ W_ih^T + bias ----
    gates = (jnp.dot(ph.astype(MXU_DTYPE), w_ref[R_WHH:R_WHH + H, :],
                     preferred_element_type=f32) + gx + blstm)              # [8, 4H]

    sig = jax.nn.sigmoid(gates)                     # one full-vreg sigmoid
    g_g = jnp.tanh(gates[:, 2 * H:3 * H])           # tanh only on the g slice
    i_g = sig[:, 0:H]
    f_g = sig[:, H:2 * H]
    o_g = sig[:, 3 * H:4 * H]

    c_new = f_g * pc + i_g * g_g
    h_new = o_g * jnp.tanh(c_new)

    hc = jnp.concatenate([h_new, c_new], axis=1)    # [8, 2H] == next step's [hp | cp]
    carry_ref[...] = hc
    out_ref[t] = hc                                 # resident output block, row t


# ---------------------------------------------------------------------------
# Wrapper: grid=(T,) recurrence with resident weights and VMEM-carried state.
# ---------------------------------------------------------------------------
@jax.jit
def lattice_rnn_sequence(x_seq, h_sp_seq, c_sp_seq, h0, c0, packed):
    T = x_seq.shape[0]
    # One packed per-step input: [h_spatial | c_spatial | x]  -> [T, B, 2H+IN]
    step_in = jnp.concatenate([h_sp_seq, c_sp_seq, x_seq], axis=-1)
    # aux: rows 0:B = initial [hp|cp] (padded to 128 lanes), rows B: = bias block.
    init = jnp.concatenate([h0, c0], axis=-1)
    aux = jnp.concatenate(
        [jnp.pad(init, ((0, 0), (0, 128 - 2 * H))), packed["bias"]], axis=0)

    out = pl.pallas_call(
        lattice_seq_kernel,
        out_shape=jax.ShapeDtypeStruct((T, B, 2 * H), jnp.float32),
        grid=(T,),
        in_specs=[
            pl.BlockSpec((1, B, 2 * H + IN), lambda t: (t, 0, 0)),   # per-step input
            pl.BlockSpec((R_END, 128), lambda t: (0, 0)),            # weight slab (resident)
            pl.BlockSpec((AUX_ROWS, 128), lambda t: (0, 0)),         # init state + biases
        ],
        # Whole output stays resident in VMEM; one HBM writeback at grid end.
        out_specs=pl.BlockSpec((T, B, 2 * H), lambda t: (0, 0, 0)),
        scratch_shapes=[pltpu.VMEM((B, 2 * H), jnp.float32)],        # carried [hp|cp]
        compiler_params=pltpu.CompilerParams(
            dimension_semantics=("arbitrary",)),
    )(step_in, packed["wslab"], aux)
    return out[..., :H], out[..., H:]


# ---------------------------------------------------------------------------
# Deterministic parameter construction (mirrors the PyTorch __init__).
# ---------------------------------------------------------------------------
def _xavier_t(key, fan_in, fan_out):
    a = (6.0 / (fan_in + fan_out)) ** 0.5
    return jax.random.uniform(key, (fan_in, fan_out), jnp.float32, -a, a)


def make_fcnn_params(key, in_dim, fc_layers, out_dim):
    ks = jax.random.split(key, 4)
    W0 = _xavier_t(ks[0], in_dim, fc_layers[0])
    W1 = _xavier_t(ks[1], fc_layers[0], fc_layers[1])
    W2 = _xavier_t(ks[2], fc_layers[1], out_dim)
    Wsk = _xavier_t(ks[3], in_dim, out_dim)          # skip_projection
    z = lambda n: jnp.zeros((1, n), jnp.float32)
    return (W0, z(fc_layers[0]), W1, z(fc_layers[1]), W2, z(out_dim), Wsk, z(out_dim))


def make_raw_params(key):
    k_hp, k_cp, k_ih, k_hh = jax.random.split(key, 4)
    return {
        "hidden_proc": make_fcnn_params(k_hp, 2 * H, FC, H),
        "cell_proc": make_fcnn_params(k_cp, 2 * H, FC, H),
        "hn_g": jnp.ones((1, H), jnp.float32), "hn_b": jnp.zeros((1, H), jnp.float32),
        "cn_g": jnp.ones((1, H), jnp.float32), "cn_b": jnp.zeros((1, H), jnp.float32),
        # LSTMCell: weight_ih [4H, IN] xavier, weight_hh [4H, H] orthogonal.
        # Module zeros both biases then fills slice [H:2H] (forget gate) of BOTH
        # b_ih and b_hh with 1.0 -> combined forget-gate bias = 2.0.
        "wih_t": _xavier_t(k_ih, IN, 4 * H),
        "whh_t": jnp.transpose(
            jax.nn.initializers.orthogonal()(k_hh, (4 * H, H), jnp.float32)),
        "b_lstm": jnp.zeros((1, 4 * H), jnp.float32).at[:, H:2 * H].set(2.0),
    }


def _blockdiag(a, b):
    r0, c0 = a.shape
    r1, c1 = b.shape
    out = jnp.zeros((r0 + r1, c0 + c1), jnp.float32)
    return out.at[:r0, :c0].set(a).at[r0:, c0:].set(b)


def _z_ordered(hW, cW):
    """Fuse the hidden-path and cell-path weights (input dim 2H each) into one
    [4H, Nh+Nc] block matrix whose ROWS follow the Z lane order [h|c|hp|cp]."""
    nh, nc = hW.shape[1], cW.shape[1]
    zh = jnp.zeros((H, nc), jnp.float32)
    zc = jnp.zeros((H, nh), jnp.float32)
    return jnp.concatenate([
        jnp.concatenate([hW[0:H], zh], axis=1),         # rows for h  (spatial hidden)
        jnp.concatenate([zc, cW[0:H]], axis=1),         # rows for c  (spatial cell)
        jnp.concatenate([hW[H:2 * H], zh], axis=1),     # rows for hp (prev hidden)
        jnp.concatenate([zc, cW[H:2 * H]], axis=1),     # rows for cp (prev cell)
    ], axis=0)


def pack_params(raw):
    hW0, hb0, hW1, hb1, hW2, hb2, hWsk, hbsk = raw["hidden_proc"]
    cW0, cb0, cW1, cb1, cW2, cb2, cWsk, cbsk = raw["cell_proc"]

    # Layer-0 and skip projection fused on the output lanes (same LHS z).
    w0sk = jnp.concatenate([_z_ordered(hW0, cW0), _z_ordered(hWsk, cWsk)], axis=1)  # [4H,128]
    # W1 / W2 side by side on the lanes (both block-diagonal over the two paths).
    w12 = jnp.concatenate([_blockdiag(hW1, cW1), _blockdiag(hW2, cW2)], axis=1)     # [2F0,128]

    # Fold the hidden-path LayerNorm affine into W_hh^T / the LSTM bias:
    #   (LN(v)*g + b) @ Whh^T == LN(v) @ (diag(g) Whh^T) + b @ Whh^T
    whh_fold = raw["hn_g"].reshape(H, 1) * raw["whh_t"]                  # [H, 4H]
    blstm_fold = raw["b_lstm"] + raw["hn_b"] @ raw["whh_t"]              # [1, 4H]

    wslab = jnp.concatenate([w0sk, w12, whh_fold, raw["wih_t"]], axis=0)
    assert wslab.shape == (R_END, 4 * H)

    bias = jnp.zeros((8, 128), jnp.float32)
    bias = bias.at[0, 0:F0].set(hb0[0]).at[0, F0:2 * F0].set(cb0[0])
    bias = bias.at[0, 2 * F0:2 * F0 + F1].set(hb1[0])
    bias = bias.at[0, 2 * F0 + F1:2 * F0 + 2 * F1].set(cb1[0])
    # Last FC bias + skip bias combined (no activation after the last layer).
    bias = bias.at[1, 0:H].set(hb2[0] + hbsk[0]).at[1, H:2 * H].set(cb2[0] + cbsk[0])
    bias = bias.at[1, 2 * H:3 * H].set(raw["cn_g"][0]).at[1, 3 * H:4 * H].set(raw["cn_b"][0])
    bias = bias.at[2, 0:4 * H].set(blstm_fold[0])

    return {"wslab": wslab.astype(MXU_DTYPE), "bias": bias}


# ---------------------------------------------------------------------------
# References.
# ---------------------------------------------------------------------------
def reference_module_f32(x_seq, h_sp_seq, c_sp_seq, h0, c0, p):
    """Step-by-step f32 transcription of LatticeRNNCell.forward (eval mode),
    using the UNPACKED parameters (independently checks packing/folding)."""
    def fcnn(v, prm):
        W0, b0, W1, b1, W2, b2, Wsk, bsk = prm
        y = jnp.maximum(v @ W0 + b0, 0.0)
        y = jnp.maximum(y @ W1 + b1, 0.0)
        return (y @ W2 + b2) + (v @ Wsk + bsk)

    def ln(v, g, b):
        mu = v.mean(-1, keepdims=True)
        var = ((v - mu) ** 2).mean(-1, keepdims=True)
        return (v - mu) / jnp.sqrt(var + LN_EPS) * g + b

    hp, cp = h0, c0
    hs, cs = [], []
    for t in range(x_seq.shape[0]):
        ph = ln(fcnn(jnp.concatenate([h_sp_seq[t], hp], 1), p["hidden_proc"]),
                p["hn_g"], p["hn_b"])
        pc = ln(fcnn(jnp.concatenate([c_sp_seq[t], cp], 1), p["cell_proc"]),
                p["cn_g"], p["cn_b"])
        gates = x_seq[t] @ p["wih_t"] + ph @ p["whh_t"] + p["b_lstm"]
        i = jax.nn.sigmoid(gates[:, 0:H])
        f = jax.nn.sigmoid(gates[:, H:2 * H])
        g = jnp.tanh(gates[:, 2 * H:3 * H])
        o = jax.nn.sigmoid(gates[:, 3 * H:4 * H])
        cp = f * pc + i * g
        hp = o * jnp.tanh(cp)
        hs.append(hp)
        cs.append(cp)
    return jnp.stack(hs), jnp.stack(cs)


def reference_matched(x_seq, h_sp_seq, c_sp_seq, h0, c0, packed):
    """Mirrors the kernel's packed math and MXU_DTYPE casts op-for-op — tight
    check of the Pallas mechanics (packing, grid carry, slicing, recurrence)."""
    f32 = jnp.float32
    w = packed["wslab"]
    bias = packed["bias"]
    w0sk = w[R_W0SK:R_W0SK + 4 * H]
    w1 = w[R_W12:R_W12 + 2 * F0, 0:2 * F1]
    w2 = w[R_W12:R_W12 + 2 * F0, 2 * F1:2 * F1 + 2 * H]
    whh = w[R_WHH:R_WHH + H]
    wih = w[R_WIH:R_WIH + IN]
    b0 = bias[0:1, 0:2 * F0]
    b1 = bias[0:1, 2 * F0:2 * F0 + 2 * F1]
    b2sk = bias[1:2, 0:2 * H]
    cn_g = bias[1:2, 2 * H:3 * H]
    cn_b = bias[1:2, 3 * H:4 * H]
    blstm = bias[2:3, 0:4 * H]

    def ln_core(v):
        mu = v.mean(-1, keepdims=True)
        var = jnp.square(v - mu).mean(-1, keepdims=True)
        return (v - mu) * lax.rsqrt(var + LN_EPS)

    hp, cp = h0, c0
    hs, cs = [], []
    for t in range(x_seq.shape[0]):
        z = jnp.concatenate([h_sp_seq[t], c_sp_seq[t], hp, cp], 1).astype(MXU_DTYPE)
        a = jnp.dot(z, w0sk, preferred_element_type=f32)
        gx = jnp.dot(x_seq[t].astype(MXU_DTYPE), wih, preferred_element_type=f32)
        y0 = jnp.maximum(a[:, 0:2 * F0] + b0, 0.0).astype(MXU_DTYPE)
        skip = a[:, 2 * F0:2 * F0 + 2 * H]
        y1 = jnp.maximum(jnp.dot(y0, w1, preferred_element_type=f32) + b1,
                         0.0).astype(MXU_DTYPE)
        proc = jnp.dot(y1, w2, preferred_element_type=f32) + skip + b2sk
        ph = ln_core(proc[:, 0:H])
        pc = ln_core(proc[:, H:2 * H]) * cn_g + cn_b
        gates = jnp.dot(ph.astype(MXU_DTYPE), whh, preferred_element_type=f32) + gx + blstm
        sig = jax.nn.sigmoid(gates)
        g = jnp.tanh(gates[:, 2 * H:3 * H])
        cp = sig[:, H:2 * H] * pc + sig[:, 0:H] * g
        hp = sig[:, 3 * H:4 * H] * jnp.tanh(cp)
        hs.append(hp)
        cs.append(cp)
    return jnp.stack(hs), jnp.stack(cs)


if __name__ == "__main__":
    root = jax.random.PRNGKey(0)
    kx, kh, kc, khp, kcp, kparam = jax.random.split(root, 6)

    # Per-step inputs: x_t, spatial-neighbor hidden/cell; hp/cp carried in time.
    x_seq = jax.random.normal(kx, (T_STEPS, B, IN), jnp.float32)
    h_sp = jax.random.normal(kh, (T_STEPS, B, H), jnp.float32)
    c_sp = jax.random.normal(kc, (T_STEPS, B, H), jnp.float32)
    h0 = jax.random.normal(khp, (B, H), jnp.float32)
    c0 = jax.random.normal(kcp, (B, H), jnp.float32)

    raw_params = make_raw_params(kparam)
    packed_params = pack_params(raw_params)

    h_k, c_k = lattice_rnn_sequence(x_seq, h_sp, c_sp, h0, c0, packed_params)
    jax.block_until_ready((h_k, c_k))
    assert h_k.shape == (T_STEPS, B, H) and c_k.shape == (T_STEPS, B, H)

    # Tight check: same packed weights and same MXU operand dtype as the kernel.
    h_m, c_m = reference_matched(x_seq, h_sp, c_sp, h0, c0, packed_params)
    assert jnp.allclose(h_k, h_m, atol=1e-2, rtol=1e-2), (
        float(jnp.max(jnp.abs(h_k - h_m))))
    assert jnp.allclose(c_k, c_m, atol=1e-2, rtol=1e-2), (
        float(jnp.max(jnp.abs(c_k - c_m))))

    # Sanity check vs. the pure-f32 module math with UNPACKED params; tolerance
    # covers bf16-MXU drift accumulated over T recurrent steps.
    mod_tol = 2e-4 if MXU_DTYPE == jnp.float32 else 0.15
    h_f, c_f = reference_module_f32(x_seq, h_sp, c_sp, h0, c0, raw_params)
    assert jnp.allclose(h_k, h_f, atol=mod_tol, rtol=mod_tol), (
        float(jnp.max(jnp.abs(h_k - h_f))))
    assert jnp.allclose(c_k, c_f, atol=mod_tol, rtol=mod_tol), (
        float(jnp.max(jnp.abs(c_k - c_f))))

    print("KERNEL_OK")
</pallas_src>

<mosaic_0001>
module attributes {stable_mosaic.version = 11 : i64} {
  func.func @lattice_seq_kernel(%arg0: i32, %arg1: memref<1x8x80xf32, #tpu.memory_space<vmem>>, %arg2: memref<240x128xbf16, #tpu.memory_space<vmem>>, %arg3: memref<16x128xf32, #tpu.memory_space<vmem>>, %arg4: memref<8x8x64xf32, #tpu.memory_space<vmem>>, %arg5: memref<8x64xf32, #tpu.memory_space<vmem>>) attributes {dimension_semantics = [#tpu.dimension_semantics<arbitrary>], iteration_bounds = array<i64: 8>, scalar_prefetch = 0 : i64, scratch_operands = 1 : i64, tpu.core_type = #tpu.core_type<tc>, window_params = [{transform_indices = @transform_0, window_bounds = array<i64: 1, 8, 80>}, {pipeline_mode = #tpu.pipeline_mode<synchronous>, transform_indices = @transform_1, window_bounds = array<i64: 240, 128>}, {pipeline_mode = #tpu.pipeline_mode<synchronous>, transform_indices = @transform_2, window_bounds = array<i64: 16, 128>}, {pipeline_mode = #tpu.pipeline_mode<synchronous>, transform_indices = @transform_3, window_bounds = array<i64: 8, 8, 64>}]} {
    %c0_i32 = arith.constant 0 : i32
    %0 = arith.cmpi eq, %arg0, %c0_i32 : i32
    %1 = arith.extui %0 : i1 to i32
    %c0_i32_0 = arith.constant 0 : i32
    %2 = arith.cmpi ne, %1, %c0_i32_0 : i32
    scf.if %2 {
      %c0_40 = arith.constant 0 : index
      %c0_41 = arith.constant 0 : index
      %109 = vector.load %arg3[%c0_40, %c0_41] : memref<16x128xf32, #tpu.memory_space<vmem>>, vector<8x64xf32>
      %c0_42 = arith.constant 0 : index
      %c0_43 = arith.constant 0 : index
      %110 = vector.load %arg5[%c0_42, %c0_43] : memref<8x64xf32, #tpu.memory_space<vmem>>, vector<8x64xf32>
      tpu.vector_store %arg5[%c0_42, %c0_43], %109 {strides = array<i32>} : memref<8x64xf32, #tpu.memory_space<vmem>>, vector<8x64xf32>,
    } else {
    }
    %c0 = arith.constant 0 : index
    %c0_1 = arith.constant 0 : index
    %c0_2 = arith.constant 0 : index
    %3 = vector.load %arg1[%c0, %c0_1, %c0_2] : memref<1x8x80xf32, #tpu.memory_space<vmem>>, vector<1x8x80xf32>
    %4 = vector.shape_cast %3 : vector<1x8x80xf32> to vector<8x80xf32>
    %5 = vector.extract_strided_slice %4 {offsets = [0, 0], sizes = [8, 64], strides = [1, 1]} : vector<8x80xf32> to vector<8x64xf32>
    %6 = vector.extract_strided_slice %4 {offsets = [0, 64], sizes = [8, 16], strides = [1, 1]} : vector<8x80xf32> to vector<8x16xf32>
    %7 = arith.truncf %6 : vector<8x16xf32> to vector<8x16xbf16>
    %c8 = arith.constant 8 : index
    %c0_3 = arith.constant 0 : index
    %8 = vector.load %arg3[%c8, %c0_3] : memref<16x128xf32, #tpu.memory_space<vmem>>, vector<1x64xf32>
    %c8_4 = arith.constant 8 : index
    %c64 = arith.constant 64 : index
    %9 = vector.load %arg3[%c8_4, %c64] : memref<16x128xf32, #tpu.memory_space<vmem>>, vector<1x64xf32>
    %c9 = arith.constant 9 : index
    %c0_5 = arith.constant 0 : index
    %10 = vector.load %arg3[%c9, %c0_5] : memref<16x128xf32, #tpu.memory_space<vmem>>, vector<1x64xf32>
    %c9_6 = arith.constant 9 : index
    %c64_7 = arith.constant 64 : index
    %11 = vector.load %arg3[%c9_6, %c64_7] : memref<16x128xf32, #tpu.memory_space<vmem>>, vector<1x32xf32>
    %c9_8 = arith.constant 9 : index
    %c96 = arith.constant 96 : index
    %12 = vector.load %arg3[%c9_8, %c96] : memref<16x128xf32, #tpu.memory_space<vmem>>, vector<1x32xf32>
    %c10 = arith.constant 10 : index
    %c0_9 = arith.constant 0 : index
    %13 = vector.load %arg3[%c10, %c0_9] : memref<16x128xf32, #tpu.memory_space<vmem>>, vector<1x128xf32>
    %c0_10 = arith.constant 0 : index
    %c0_11 = arith.constant 0 : index
    %14 = vector.load %arg5[%c0_10, %c0_11] : memref<8x64xf32, #tpu.memory_space<vmem>>, vector<8x64xf32>
    %15 = tpu.concatenate %5, %14 in 1 : vector<8x64xf32>, vector<8x64xf32> -> vector<8x128xf32>
    %16 = arith.truncf %15 : vector<8x128xf32> to vector<8x128xbf16>
    %c0_12 = arith.constant 0 : index
    %c0_13 = arith.constant 0 : index
    %17 = vector.load %arg2[%c0_12, %c0_13] : memref<240x128xbf16, #tpu.memory_space<vmem>>, vector<128x128xbf16>
    %cst = arith.constant dense<0.000000e+00> : vector<8x128xf32>
    %18 = tpu.matmul %16, %17, %cst {dimension_numbers = #tpu.dot_dimension_numbers<[1], [0], [0], [1], [0, 0, 1, 1], [], []>} : vector<8x128xbf16>, vector<128x128xbf16>, vector<8x128xf32> -> vector<8x128xf32>
    %c224 = arith.constant 224 : index
    %c0_14 = arith.constant 0 : index
    %19 = vector.load %arg2[%c224, %c0_14] : memref<240x128xbf16, #tpu.memory_space<vmem>>, vector<16x128xbf16>
    %cst_15 = arith.constant dense<0.000000e+00> : vector<8x128xf32>
    %20 = tpu.matmul %7, %19, %cst_15 {dimension_numbers = #tpu.dot_dimension_numbers<[1], [0], [0], [1], [0, 0, 1, 1], [], []>} : vector<8x16xbf16>, vector<16x128xbf16>, vector<8x128xf32> -> vector<8x128xf32>
    %21 = vector.extract_strided_slice %18 {offsets = [0, 0], sizes = [8, 64], strides = [1, 1]} : vector<8x128xf32> to vector<8x64xf32>
    %22 = vector.broadcast %8 : vector<1x64xf32> to vector<8x64xf32>
    %23 = arith.addf %21, %22 : vector<8x64xf32>
    %cst_16 = arith.constant 0.000000e+00 : f32
    %24 = vector.broadcast %cst_16 : f32 to vector<8x64xf32>
    %25 = arith.maximumf %23, %24 : vector<8x64xf32>
    %26 = arith.truncf %25 : vector<8x64xf32> to vector<8x64xbf16>
    %27 = vector.extract_strided_slice %18 {offsets = [0, 64], sizes = [8, 64], strides = [1, 1]} : vector<8x128xf32> to vector<8x64xf32>
    %c128 = arith.constant 128 : index
    %c0_17 = arith.constant 0 : index
    %28 = vector.load %arg2[%c128, %c0_17] : memref<240x128xbf16, #tpu.memory_space<vmem>>, vector<64x64xbf16>
    %cst_18 = arith.constant dense<0.000000e+00> : vector<8x64xf32>
    %29 = tpu.matmul %26, %28, %cst_18 {dimension_numbers = #tpu.dot_dimension_numbers<[1], [0], [0], [1], [0, 0, 1, 1], [], []>} : vector<8x64xbf16>, vector<64x64xbf16>, vector<8x64xf32> -> vector<8x64xf32>
    %30 = vector.broadcast %9 : vector<1x64xf32> to vector<8x64xf32>
    %31 = arith.addf %29, %30 : vector<8x64xf32>
    %cst_19 = arith.constant 0.000000e+00 : f32
    %32 = vector.broadcast %cst_19 : f32 to vector<8x64xf32>
    %33 = arith.maximumf %31, %32 : vector<8x64xf32>
    %34 = arith.truncf %33 : vector<8x64xf32> to vector<8x64xbf16>
    %c128_20 = arith.constant 128 : index
    %c64_21 = arith.constant 64 : index
    %35 = vector.load %arg2[%c128_20, %c64_21] : memref<240x128xbf16, #tpu.memory_space<vmem>>, vector<64x64xbf16>
    %cst_22 = arith.constant dense<0.000000e+00> : vector<8x64xf32>
    %36 = tpu.matmul %34, %35, %cst_22 {dimension_numbers = #tpu.dot_dimension_numbers<[1], [0], [0], [1], [0, 0, 1, 1], [], []>} : vector<8x64xbf16>, vector<64x64xbf16>, vector<8x64xf32> -> vector<8x64xf32>
    %37 = arith.addf %36, %27 : vector<8x64xf32>
    %38 = vector.broadcast %10 : vector<1x64xf32> to vector<8x64xf32>
    %39 = arith.addf %37, %38 : vector<8x64xf32>
    %40 = vector.extract_strided_slice %39 {offsets = [0, 0], sizes = [8, 32], strides = [1, 1]} : vector<8x64xf32> to vector<8x32xf32>
    %cst_23 = arith.constant dense<0.000000e+00> : vector<8xf32>
    %41 = vector.multi_reduction <add>, %40, %cst_23 [1] : vector<8x32xf32> to vector<8xf32>
    %42 = vector.shape_cast %41 : vector<8xf32> to vector<8x1xf32>
    %cst_24 = arith.constant 3.200000e+01 : f32
    %43 = vector.broadcast %cst_24 : f32 to vector<8x1xf32>
    %44 = arith.divf %42, %43 : vector<8x1xf32>
    %45 = vector.broadcast %44 : vector<8x1xf32> to vector<8x32xf32>
    %46 = arith.subf %40, %45 : vector<8x32xf32>
    %47 = arith.mulf %46, %46 : vector<8x32xf32>
    %cst_25 = arith.constant dense<0.000000e+00> : vector<8xf32>
    %48 = vector.multi_reduction <add>, %47, %cst_25 [1] : vector<8x32xf32> to vector<8xf32>
    %49 = vector.shape_cast %48 : vector<8xf32> to vector<8x1xf32>
    %cst_26 = arith.constant 3.200000e+01 : f32
    %50 = vector.broadcast %cst_26 : f32 to vector<8x1xf32>
    %51 = arith.divf %49, %50 : vector<8x1xf32>
    %52 = vector.broadcast %44 : vector<8x1xf32> to vector<8x32xf32>
    %53 = arith.subf %40, %52 : vector<8x32xf32>
    %cst_27 = arith.constant 9.99999974E-6 : f32
    %54 = vector.broadcast %cst_27 : f32 to vector<8x1xf32>
    %55 = arith.addf %51, %54 : vector<8x1xf32>
    %56 = math.rsqrt %55 : vector<8x1xf32>
    %57 = vector.broadcast %56 : vector<8x1xf32> to vector<8x32xf32>
    %58 = arith.mulf %53, %57 : vector<8x32xf32>
    %59 = vector.extract_strided_slice %39 {offsets = [0, 32], sizes = [8, 32], strides = [1, 1]} : vector<8x64xf32> to vector<8x32xf32>
    %cst_28 = arith.constant dense<0.000000e+00> : vector<8xf32>
    %60 = vector.multi_reduction <add>, %59, %cst_28 [1] : vector<8x32xf32> to vector<8xf32>
    %61 = vector.shape_cast %60 : vector<8xf32> to vector<8x1xf32>
    %cst_29 = arith.constant 3.200000e+01 : f32
    %62 = vector.broadcast %cst_29 : f32 to vector<8x1xf32>
    %63 = arith.divf %61, %62 : vector<8x1xf32>
    %64 = vector.broadcast %63 : vector<8x1xf32> to vector<8x32xf32>
    %65 = arith.subf %59, %64 : vector<8x32xf32>
    %66 = arith.mulf %65, %65 : vector<8x32xf32>
    %cst_30 = arith.constant dense<0.000000e+00> : vector<8xf32>
    %67 = vector.multi_reduction <add>, %66, %cst_30 [1] : vector<8x32xf32> to vector<8xf32>
    %68 = vector.shape_cast %67 : vector<8xf32> to vector<8x1xf32>
    %cst_31 = arith.constant 3.200000e+01 : f32
    %69 = vector.broadcast %cst_31 : f32 to vector<8x1xf32>
    %70 = arith.divf %68, %69 : vector<8x1xf32>
    %71 = vector.broadcast %63 : vector<8x1xf32> to vector<8x32xf32>
    %72 = arith.subf %59, %71 : vector<8x32xf32>
    %cst_32 = arith.constant 9.99999974E-6 : f32
    %73 = vector.broadcast %cst_32 : f32 to vector<8x1xf32>
    %74 = arith.addf %70, %73 : vector<8x1xf32>
    %75 = math.rsqrt %74 : vector<8x1xf32>
    %76 = vector.broadcast %75 : vector<8x1xf32> to vector<8x32xf32>
    %77 = arith.mulf %72, %76 : vector<8x32xf32>
    %78 = vector.broadcast %11 : vector<1x32xf32> to vector<8x32xf32>
    %79 = arith.mulf %77, %78 : vector<8x32xf32>
    %80 = vector.broadcast %12 : vector<1x32xf32> to vector<8x32xf32>
    %81 = arith.addf %79, %80 : vector<8x32xf32>
    %82 = arith.truncf %58 : vector<8x32xf32> to vector<8x32xbf16>
    %c192 = arith.constant 192 : index
    %c0_33 = arith.constant 0 : index
    %83 = vector.load %arg2[%c192, %c0_33] : memref<240x128xbf16, #tpu.memory_space<vmem>>, vector<32x128xbf16>
    %cst_34 = arith.constant dense<0.000000e+00> : vector<8x128xf32>
    %84 = tpu.matmul %82, %83, %cst_34 {dimension_numbers = #tpu.dot_dimension_numbers<[1], [0], [0], [1], [0, 0, 1, 1], [], []>} : vector<8x32xbf16>, vector<32x128xbf16>, vector<8x128xf32> -> vector<8x128xf32>
    %85 = arith.addf %84, %20 : vector<8x128xf32>
    %86 = vector.broadcast %13 : vector<1x128xf32> to vector<8x128xf32>
    %87 = arith.addf %85, %86 : vector<8x128xf32>
    %88 = arith.negf %87 : vector<8x128xf32>
    %89 = math.exp %88 : vector<8x128xf32>
    %cst_35 = arith.constant 1.000000e+00 : f32
    %90 = vector.broadcast %cst_35 : f32 to vector<8x128xf32>
    %91 = arith.addf %90, %89 : vector<8x128xf32>
    %92 = arith.divf %90, %91 : vector<8x128xf32>
    %93 = vector.extract_strided_slice %87 {offsets = [0, 64], sizes = [8, 32], strides = [1, 1]} : vector<8x128xf32> to vector<8x32xf32>
    %94 = math.tanh %93 : vector<8x32xf32>
    %95 = vector.extract_strided_slice %92 {offsets = [0, 0], sizes = [8, 32], strides = [1, 1]} : vector<8x128xf32> to vector<8x32xf32>
    %96 = vector.extract_strided_slice %92 {offsets = [0, 32], sizes = [8, 32], strides = [1, 1]} : vector<8x128xf32> to vector<8x32xf32>
    %97 = vector.extract_strided_slice %92 {offsets = [0, 96], sizes = [8, 32], strides = [1, 1]} : vector<8x128xf32> to vector<8x32xf32>
    %98 = arith.mulf %96, %81 : vector<8x32xf32>
    %99 = arith.mulf %95, %94 : vector<8x32xf32>
    %100 = arith.addf %98, %99 : vector<8x32xf32>
    %101 = math.tanh %100 : vector<8x32xf32>
    %102 = arith.mulf %97, %101 : vector<8x32xf32>
    %103 = tpu.concatenate %102, %100 in 1 : vector<8x32xf32>, vector<8x32xf32> -> vector<8x64xf32>
    %c0_36 = arith.constant 0 : index
    %c0_37 = arith.constant 0 : index
    %104 = vector.load %arg5[%c0_36, %c0_37] : memref<8x64xf32, #tpu.memory_space<vmem>>, vector<8x64xf32>
    tpu.vector_store %arg5[%c0_36, %c0_37], %103 {strides = array<i32>} : memref<8x64xf32, #tpu.memory_space<vmem>>, vector<8x64xf32>,
    %105 = arith.index_cast %arg0 : i32 to index
    %c0_38 = arith.constant 0 : index
    %c0_39 = arith.constant 0 : index
    %106 = vector.load %arg4[%105, %c0_38, %c0_39] : memref<8x8x64xf32, #tpu.memory_space<vmem>>, vector<1x8x64xf32>
    %107 = vector.shape_cast %106 : vector<1x8x64xf32> to vector<8x64xf32>
    %108 = vector.shape_cast %103 : vector<8x64xf32> to vector<1x8x64xf32>
    tpu.vector_store %arg4[%105, %c0_38, %c0_39], %108 {strides = array<i32>} : memref<8x8x64xf32, #tpu.memory_space<vmem>>, vector<1x8x64xf32>,
    return
  }
  func.func @transform_0(%arg0: i32) -> (i32, i32, i32) {
    %c0_i32 = arith.constant 0 : i32
    %c0_i32_0 = arith.constant 0 : i32
    %c0_i32_1 = arith.constant 0 : i32
    return %arg0, %c0_i32, %c0_i32_0 : i32, i32, i32
  }
  func.func @transform_1(%arg0: i32) -> (i32, i32) {
    %c0_i32 = arith.constant 0 : i32
    %c0_i32_0 = arith.constant 0 : i32
    %c0_i32_1 = arith.constant 0 : i32
    return %c0_i32, %c0_i32_0 : i32, i32
  }
  func.func @transform_2(%arg0: i32) -> (i32, i32) {
    %c0_i32 = arith.constant 0 : i32
    %c0_i32_0 = arith.constant 0 : i32
    %c0_i32_1 = arith.constant 0 : i32
    return %c0_i32, %c0_i32_0 : i32, i32
  }
  func.func @transform_3(%arg0: i32) -> (i32, i32, i32) {
    %c0_i32 = arith.constant 0 : i32
    %c0_i32_0 = arith.constant 0 : i32
    %c0_i32_1 = arith.constant 0 : i32
    %c0_i32_2 = arith.constant 0 : i32
    return %c0_i32, %c0_i32_0, %c0_i32_1 : i32, i32, i32
  }
}

</mosaic_0001>

<bundles_post_ra>
// kernel: lattice_rnn_sequence.1
= control target key start
LH: loop header
LB: loop body
LE: loop exit
PB: predicated region body
PF: predicated region fallthrough
CT: control target
= control target key end

     0   :  { %s845_s12 = smov 0   ;;  %s979_s0 = inlined_call_operand.vmem [shape: f32[8,8,80], index: 0, kind: input, shape index: {}]   ;;  %s980_s1 = inlined_call_operand.vmem [shape: bf16[240,128], index: 1, kind: input, shape index: {}]   ;;  %s981_s2 = inlined_call_operand.vmem [shape: f32[16,128], index: 2, kind: input, shape index: {}]   ;;  %s982_s3 = inlined_call_operand.vmem [shape: f32[8,8,64], index: 3, kind: output, shape index: {}]  }
   0x1 LB: > { %s851_s13 = sadd.s32 4294967295, %s818_s12   ;;  %p661_p0 = scmp.ge.s32.totalorder %s818_s12, 1  ;;  %s818_s12 = sphi %s845_s12, %s13_s12  }
   0x2   : > { %p131_p1 = scmp.lt.s32.totalorder %s818_s12, 9 }
   0x4   : > { %p132_p2 = pnand %p661_p0, %p131_p1 }
   0x5   : > { %p149_p3 = scmp.lt.s32.totalorder (!%p132_p2), %s851_s13, 7  ;;  %p663_p4 = scmp.ne.s32.totalorder (!%p132_p2), %s851_s13, 0 }
   0x6   : > { %135 = sbr.rel (%p132_p2) target bundleno = 1810 (0x712), region = 32 }
   0xd   : > { %s150_s14 = scalar_select %p149_p3, %s851_s13, 7 }
   0xe   : > { %157 = sbr.rel (%p663_p4) target bundleno = 21 (0x15), region = 36  ;;  %v158_v0 = vld [vmem:[%s981_s2] sm:$0xff] (!%p663_p4)  ;;  %vm159_vm0 = vcmask (!%p663_p4), 523264  }
   0xf   : > { %s662_s15 = sshll.u32 %s150_s14, 3  ;;  %160 = vst.msk [vmem:[#allocation2] sm:$0xff] (!%p663_p4), %vm159_vm0, %v158_v0 }
  0x10   : > { %s152_s18 = scalar_lea.vmem %s979_s0, %s662_s15 }
  0x15 PF: > { %v785_v2 = vld [vmem:[%s980_s1] sm:$0xff]   ;;  %s820_s23 = smov 64   ;;  %v821_v3 = vmov 0.0   ;;  %v786_v4 = vld [vmem:[%s980_s1 + $0x8] sm:$0xff]   ;;  %vm822_vm1 = vmmov 0   ;;  %v787_v5 = vld [vmem:[%s980_s1 + $0x10] sm:$0xff]  }
  0x16   : > { %v166_v1 = vld [vmem:[#allocation2] sm:$0xff]  ;;  %714 = vmatprep.subr.bf16.mxu0 %v821_v3  ;;  %734 = vmatprep.subr.bf16.mxu1 %v821_v3  ;;  %v788_v7 = vld [vmem:[%s980_s1 + $0x18] sm:$0xff]   ;;  %v793_v9 = vld [vmem:[%s980_s1 + $0x70] sm:$0xff]   ;;  %vm171_vm2 = vcmask 523264   ;;  %vm289_vm3 = vcmask 130048   ;;  %vm485_vm4 = vcmask 261120  }
  0x17   : > { %168 = vrot.lane.b32.xlu0 %v166_v1, %s820_s23  ;;  %715 = vmatpush3.bf16.msra.mxu0 %v785_v2  ;;  %v161_v6 = vld [vmem:[%s152_s18] sm:$0xff]  ;;  %v795_v11 = vld [vmem:[%s980_s1 + $0x48] sm:$0xff]   ;;  %v791_v15 = vld [vmem:[%s980_s1 + $0x30] sm:$0xff]   ;;  %s823_s28 = smov 96   ;;  %s824_s8 = smov 32  }
  0x18   : > { %716 = vmatprep.subr.bf16.mxu0 %v821_v3  ;;  %730 = vmatprep.mubr.msk.bf16.mxu0 %vm822_vm1, %v821_v3  ;;  %v162_v8 = vpack.c.bf16 %v161_v6, %v161_v6  ;;  %v794_v10 = vld [vmem:[%s980_s1 + $0x40] sm:$0xff]   ;;  %v674_v13 = vld [vmem:[%s981_s2 + $0x8] ss:$0 sm:$0xff]  ;;  %v792_v16 = vld [vmem:[%s980_s1 + $0x38] sm:$0xff]   ;;  %s687_s9 = sshll.u32 %s851_s13, 3 }
  0x19   : > { %736 = vmatprep.mubr.msk.bf16.mxu1 %vm822_vm1, %v821_v3  ;;  %735 = vmatpush3.bf16.msra.mxu1 %v793_v9  ;;  %v789_v12 = vld [vmem:[%s980_s1 + $0x20] sm:$0xff]   ;;  %v790_v14 = vld [vmem:[%s980_s1 + $0x28] sm:$0xff]   ;;  %v796_v21 = vld [vmem:[%s980_s1 + $0x50] sm:$0xff]   ;;  %s626_s14 = scalar_lea.vmem %s982_s3, %s687_s9 }
  0x1a   : > { %421 = vrot.lane.b32.xlu1 %v794_v10, %s820_s23  ;;  %740 = vmatprep.subr.bf16.mxu1 %v821_v3  ;;  %v797_v22 = vld [vmem:[%s980_s1 + $0x58] sm:$0xff]   ;;  %v681_v47 = vld [vmem:[%s981_s2 + $0x9] ss:$0 sm:$0xff]  ;;  %v798_v62 = vld [vmem:[%s980_s1 + $0x60] sm:$0xff]  }
  0x1b   : > { %717 = vmatpush3.bf16.msra.mxu0 %v786_v4  ;;  %281 = vrot.lane.b32.xlu0 %v162_v8, %s820_s23  ;;  %v799_v63 = vld [vmem:[%s980_s1 + $0x68] sm:$0xff]  }
  0x1c   : > { %718 = vmatprep.subr.bf16.mxu0 %v821_v3 }
  0x1e   : > { %423 = vrot.lane.b32.xlu1 %v795_v11, %s820_s23 }
  0x1f   : > { %719 = vmatpush3.bf16.msra.mxu0 %v787_v5  ;;  %425 = vrot.lane.b32.xlu0 %v796_v21, %s820_s23 }
  0x20   : > { %720 = vmatprep.subr.bf16.mxu0 %v821_v3 }
  0x22   : > { %373 = vrot.lane.b32.xlu1 %v674_v13, %s820_s23 }
  0x23   : > { %721 = vmatpush3.bf16.msra.mxu0 %v788_v7  ;;  %427 = vrot.lane.b32.xlu0 %v797_v22, %s820_s23 }
  0x24   : > { %722 = vmatprep.subr.bf16.mxu0 %v821_v3 }
  0x27   : > { %723 = vmatpush3.bf16.msra.mxu0 %v789_v12 }
  0x28   : > { %724 = vmatprep.subr.bf16.mxu0 %v821_v3 }
  0x2b   : > { %725 = vmatpush3.bf16.msra.mxu0 %v790_v14 }
  0x2c   : > { %726 = vmatprep.subr.bf16.mxu0 %v821_v3 }
  0x2f   : > { %727 = vmatpush3.bf16.msra.mxu0 %v791_v15 }
  0x30   : > { %728 = vmatprep.subr.bf16.mxu0 %v821_v3 }
  0x33   : > { %729 = vmatpush3.bf16.msra.mxu0 %v792_v16 }
  0x34   : > { %764 = vmatprep.subr.bf16.mxu0 %v821_v3 }
  0x89   : > { %v169_v17 = vpop.permute.xlu0 %168 }
  0x8a   : > { %v172_v18 = vsel %vm171_vm2, %v161_v6, %v169_v17 }
  0x8b   : > { %v173_v19 = vpack.c.bf16 %v172_v18, %v172_v18 }
  0x8c   : > { %v422_v30 = vpop.permute.xlu1 %421 }
  0x8d   : > { %731 = vmatmul.mubr.bf16.vlgmr.msra.gmra.mrb[0].mxu0 %v173_v19  ;;  %v282_v20 = vpop.permute.xlu0 %281 }
  0x8e   : > { %768 = vmatprep.mubr.msk.bf16.mxu0 %vm822_vm1, %v821_v3  ;;  %737 = vmatmul.mubr.msk.bf16.vlgmr.msra.gmra.mrb[0].mxu1 %vm289_vm3, %v282_v20 }
  0x8f   : > { %741 = vmatpush3.bf16.msra.mxu1 %v794_v10  ;;  %748 = vmatprep.mubr.msk.bf16.mxu1 %vm822_vm1, %v821_v3 }
  0x90   : > { %742 = vmatprep.subr.bf16.mxu1 %v821_v3  ;;  %v424_v35 = vpop.permute.xlu1 %423  ;;  %765 = vmatpush3.bf16.msra.mxu0 %v798_v62 }
  0x91   : > { %v426_v36 = vpop.permute.xlu0 %425  ;;  %766 = vmatprep.subr.bf16.mxu0 %v821_v3 }
  0x93   : > { %743 = vmatpush3.bf16.msra.mxu1 %v795_v11 }
  0x94   : > { %744 = vmatprep.subr.bf16.mxu1 %v821_v3  ;;  %v374_v38 = vpop.permute.xlu1 %373  ;;  %767 = vmatpush3.bf16.msra.mxu0 %v799_v63 }
  0x95   : > { %v428_v37 = vpop.permute.xlu0 %427 }
  0x97   : > { %745 = vmatpush3.bf16.msra.mxu1 %v796_v21 }
  0x98   : > { %746 = vmatprep.subr.bf16.mxu1 %v821_v3 }
  0x9b   : > { %747 = vmatpush3.bf16.msra.mxu1 %v797_v22 }
  0x9c   : > { %752 = vmatprep.subr.bf16.mxu1 %v821_v3 }
 0x160   : > { %v272_v23 = vpop.f32.mrb[0].mxu0 }
 0x161   : > { %v337_v24 = vadd.f32 %v674_v13, %v272_v23  ;;  %434 = vrot.lane.b32.xlu1 %v272_v23, %s820_s23  ;;  %v732_v25 = vpop.f32.mrb[1].mxu0  ;;  %v938_v31 = vpop.f32.mrb[0].mxu1 }
 0x162   : > { %v275_v26 = vpop.f32.mrb[2].mxu0  ;;  %v738_v32 = vpop.f32.mrb[1].mxu1 }
 0x163   : > { %v338_v27 = vmax.f32 %v337_v24, 0.0  ;;  %v733_v28 = vpop.f32.mrb[3].mxu0  ;;  %v330_v33 = vpop.f32.mrb[2].mxu1 }
 0x164   : > { %v739_v34 = vpop.f32.mrb[3].mxu1 }
 0x165   : > { %v339_v29 = vpack.c.bf16 %v338_v27, %v338_v27 }
 0x167   : > { %749 = vmatmul.mubr.msk.bf16.vlgmr.msra.gmra.mrb[4].mxu1 %vm171_vm2, %v339_v29 }
 0x168   : > { %753 = vmatpush3.bf16.msra.mxu1 %v422_v30  ;;  %760 = vmatprep.mubr.msk.bf16.mxu1 %vm822_vm1, %v821_v3 }
 0x169   : > { %754 = vmatprep.subr.bf16.mxu1 %v821_v3 }
 0x16c   : > { %755 = vmatpush3.bf16.msra.mxu1 %v424_v35 }
 0x16d   : > { %756 = vmatprep.subr.bf16.mxu1 %v821_v3 }
 0x170   : > { %757 = vmatpush3.bf16.msra.mxu1 %v426_v36 }
 0x171   : > { %758 = vmatprep.subr.bf16.mxu1 %v821_v3  ;;  %v685_v3 = vld [vmem:[%s981_s2 + $0xa] ss:$0 sm:$0xff] }
 0x174   : > { %759 = vmatpush3.bf16.msra.mxu1 %v428_v37 }
 0x1d3   : > { %v435_v46 = vpop.permute.xlu1 %434 }
 0x23a   : > { %v413_v39 = vpop.f32.mrb[4].mxu1 }
 0x23b   : > { %v414_v40 = vadd.f32 %v413_v39, %v374_v38  ;;  %v750_v41 = vpop.f32.mrb[5].mxu1 }
 0x23c   : > { %v416_v42 = vpop.f32.mrb[6].mxu1 }
 0x23d   : > { %v419_v43 = vmax.f32 %v414_v40, 0.0  ;;  %v751_v44 = vpop.f32.mrb[7].mxu1 }
 0x23f   : > { %v420_v45 = vpack.c.bf16 %v419_v43, %v419_v43 }
 0x241   : > { %761 = vmatmul.mubr.msk.bf16.vlgmr.msra.gmra.mrb[8].mxu1 %vm171_vm2, %v420_v45 }
 0x314   : > { %v474_v48 = vpop.f32.mrb[8].mxu1 }
 0x315   : > { %v475_v49 = vadd.f32 %v474_v48, %v435_v46  ;;  %v762_v50 = vpop.f32.mrb[9].mxu1 }
 0x316   : > { %v477_v51 = vpop.f32.mrb[10].mxu1 }
 0x317   : > { %v484_v52 = vadd.f32 %v681_v47, %v475_v49  ;;  %v763_v53 = vpop.f32.mrb[11].mxu1 }
 0x319   : > { %v486_v54 = vsel %vm485_vm4, %v484_v52, 0.0 }
 0x31a   : > { %487 = vadd.xlane.f32.xlu0 %v486_v54 }
 0x330   : > { %501 = vrot.lane.b32.xlu0 %v484_v52, %s823_s28 }
 0x3a7   : > { %v488_v55 = vpop.xlane.xlu0 %487 }
 0x3a8   : > { %v490_v56 = vmul.f32 0.03125, %v488_v55 }
 0x3aa   : > { %v491_v57 = vsub.f32 %v484_v52, %v490_v56 }
 0x3ab   : > { %v502_v60 = vpop.permute.xlu0 %501 }
 0x3ac   : > { %v492_v58 = vmul.f32 %v491_v57, %v491_v57  ;;  %v504_v61 = vsel %vm485_vm4, %v502_v60, 0.0 }
 0x3ae   : > { %v493_v59 = vsel %vm485_vm4, %v492_v58, 0.0 }
 0x3af   : > { %494 = vadd.xlane.f32.xlu1 %v493_v59 }
 0x3b3   : > { %505 = vadd.xlane.f32.xlu1 %v504_v61 }
 0x43c   : > { %v495_v0 = vpop.xlane.xlu1 %494 }
 0x43d   : > { %v496_v1 = vmul.f32 0.03125, %v495_v0 }
 0x43f   : > { %v497_v2 = vadd.f32 1e-05, %v496_v1 }
 0x440   : > { %v506_v4 = vpop.xlane.xlu1 %505 }
 0x441   : > { %800 = vrsqrt.f32 %v497_v2  ;;  %v507_v5 = vmul.f32 0.03125, %v506_v4 }
 0x443   : > { %v508_v6 = vsub.f32 %v484_v52, %v507_v5 }
 0x445   : > { %v509_v7 = vmul.f32 %v508_v6, %v508_v6 }
 0x447   : > { %511 = vrot.lane.b32.xlu1 %v509_v7, %s823_s28 }
 0x44b   : > { %v801_v8 = vpop.eup %800  ;;  %522 = vrot.lane.b32.xlu1 %v681_v47, %s823_s28 }
 0x44c   : > { %v499_v9 = vmul.f32 %v801_v8, %v491_v57 }
 0x44e   : > { %v530_v10 = vpack.c.bf16 %v499_v9, %v499_v9 }
 0x44f   : > { %526 = vrot.lane.b32.xlu1 %v681_v47, %s820_s23 }
 0x450   : > { %769 = vmatmul.mubr.msk.bf16.vlgmr.msra.gmra.mrb[4].mxu0 %vm485_vm4, %v530_v10 }
 0x4b9   : > { %v512_v18 = vpop.permute.xlu1 %511 }
 0x4ba   : > { %v514_v19 = vsel %vm485_vm4, %v512_v18, 0.0 }
 0x4bd   : > { %v523_v30 = vpop.permute.xlu1 %522 }
 0x4c1   : > { %v527_v33 = vpop.permute.xlu1 %526 }
 0x523   : > { %v584_v11 = vpop.f32.mrb[4].mxu0 }
 0x524   : > { %v585_v12 = vadd.f32 %v584_v11, %v938_v31  ;;  %v770_v13 = vpop.f32.mrb[5].mxu0 }
 0x525   : > { %v587_v14 = vpop.f32.mrb[6].mxu0 }
 0x526   : > { %v594_v15 = vadd.f32 %v685_v3, %v585_v12  ;;  %v771_v16 = vpop.f32.mrb[7].mxu0 }
 0x528   : > { %802 = vtanh.f32 %v594_v15  ;;  %v686_v20 = vmul.f32 -1.442695, %v594_v15 }
 0x52a   : > { %804 = vpow2.f32 %v686_v20 }
 0x532   : > { %v803_v17 = vpop.eup %802 }
 0x533   : > { %604 = vrot.lane.b32.xlu0 %v803_v17, %s820_s23 }
 0x534   : > { %v805_v21 = vpop.eup %804 }
 0x535   : > { %v598_v22 = vadd.f32 1.0, %v805_v21 }
 0x537   : > { %806 = vrcp.f32 %v598_v22 }
 0x541   : > { %v807_v23 = vpop.eup %806 }
 0x552   : > { %515 = vadd.xlane.f32.xlu0 %v514_v19 }
 0x5a5   : > { %v605_v24 = vpop.permute.xlu0 %604 }
 0x5a6   : > { %v607_v25 = vmul.f32 %v807_v23, %v605_v24 }
 0x5a8   : > { %609 = vrot.lane.b32.xlu1 %v607_v25, %s824_s8 }
 0x5df   : > { %v516_v26 = vpop.xlane.xlu0 %515 }
 0x5e0   : > { %v517_v27 = vmul.f32 0.03125, %v516_v26 }
 0x5e2   : > { %v518_v28 = vadd.f32 1e-05, %v517_v27 }
 0x5e4   : > { %808 = vrsqrt.f32 %v518_v28 }
 0x5ee   : > { %v809_v29 = vpop.eup %808 }
 0x5ef   : > { %v520_v31 = vmul.f32 %v809_v29, %v508_v6 }
 0x5f1   : > { %v525_v32 = vmul.f32 %v523_v30, %v520_v31 }
 0x5f3   : > { %v529_v34 = vadd.f32 %v527_v33, %v525_v32 }
 0x5f5   : > { %v602_v35 = vmul.f32 %v807_v23, %v529_v34 }
 0x61a   : > { %v610_v36 = vpop.permute.xlu1 %609 }
 0x61b   : > { %v612_v37 = vadd.f32 %v610_v36, %v602_v35 }
 0x61d   : > { %810 = vtanh.f32 %v612_v37 }
 0x627   : > { %v811_v38 = vpop.eup %810 }
 0x628   : > { %615 = vrot.lane.b32.xlu1 %v811_v38, %s820_s23 }
 0x69a   : > { %v616_v39 = vpop.permute.xlu1 %615 }
 0x69b   : > { %v618_v40 = vmul.f32 %v807_v23, %v616_v39 }
 0x69d   : > { %620 = vrot.lane.b32.xlu1 %v618_v40, %s824_s8 }
 0x70f   : > { %v621_v41 = vpop.permute.xlu1 %620 }
 0x710   : > { %v623_v42 = vsel %vm485_vm4, %v621_v41, %v612_v37 }
 0x711   : > { %624 = vst.msk [vmem:[#allocation2] sm:$0xff] %vm171_vm2, %v623_v42  ;;  %627 = vst.msk [vmem:[%s626_s14] sm:$0xff] %vm171_vm2, %v623_v42 }
 0x712 PF: > { %s13_s12 = sadd.s32 1, %s818_s12  }
 0x713   : > { %p10_p5 = scmp.ge.s32.totalorder %s13_s12, 10  }
 0x715   :  { %12 = sbr.rel (!%p10_p5) target bundleno = 1 (0x1), region = 63 }

</bundles_post_ra>
